<compile_context>
chip_gen: v7x
topology: tpu7x:2x2x1
jax: 0.10.0
libtpu: 0.0.40
codegen_flags: <defaults>
</compile_context>

<pallas_src>
import jax
import jax.numpy as jnp
from jax.experimental import pallas as pl
from jax.experimental.pallas import tpu as pltpu

LANE = 128
SUBLANE = 8


def _round_up(x, m):
    return ((x + m - 1) // m) * m


def time_embedding_kernel(t_ref, w1_ref, b1_ref, w2_ref, b2_ref, o_ref):
    # t_ref:  (TB, 1)    float32   (batch tile of timesteps)
    # w1_ref: (1, Ep)    b1_ref: (1, Ep)
    # w2_ref: (Ep, Ep)   b2_ref: (1, Ep)
    # o_ref:  (TB, Ep)
    t = t_ref[...]                                    # (TB, 1)

    # linear1 on the VPU: (TB,1) x (1,Ep) outer product == broadcast multiply.
    h = t * w1_ref[...] + b1_ref[...]                 # (TB, Ep)
    h = jnp.maximum(h, 0.0)                           # ReLU, fused in vregs

    # linear2 on the MXU: lane-dense (TB, Ep) @ (Ep, Ep).
    out = jnp.dot(h, w2_ref[...], preferred_element_type=jnp.float32) + b2_ref[...]
    o_ref[...] = out.astype(o_ref.dtype)


def time_embedding(t, w1, b1, w2, b2, *, max_block_b=512):
    """t: (B,) timesteps.  Weights stored as (in, out).  Returns (B, E) f32."""
    t2d = t.reshape(-1, 1).astype(jnp.float32)        # == t.unsqueeze(-1).float()
    B = t2d.shape[0]
    E = w1.shape[1]

    # Lane-dense embedding width; batch tile sized for the DMA pipeline but
    # small enough to fit v7x's 64 MiB VMEM with wide margin.
    Ep = _round_up(E, LANE)
    TB = min(max_block_b, _round_up(B, SUBLANE))
    Bp = _round_up(B, TB)

    # Zero padding keeps the math exact: padded w1/b1 columns give h == 0
    # after ReLU, padded w2 rows/cols and b2 columns contribute 0.
    t_p = jnp.pad(t2d, ((0, Bp - B), (0, 0)))
    w1_p = jnp.pad(w1, ((0, 0), (0, Ep - E)))
    b1_p = jnp.pad(b1, ((0, 0), (0, Ep - E)))
    w2_p = jnp.pad(w2, ((0, Ep - E), (0, Ep - E)))
    b2_p = jnp.pad(b2, ((0, 0), (0, Ep - E)))

    grid = (Bp // TB,)

    out = pl.pallas_call(
        time_embedding_kernel,
        out_shape=jax.ShapeDtypeStruct((Bp, Ep), jnp.float32),
        grid_spec=pltpu.PrefetchScalarGridSpec(
            num_scalar_prefetch=0,
            grid=grid,
            in_specs=[
                pl.BlockSpec((TB, 1), lambda i: (i, 0)),    # batch tile of t
                pl.BlockSpec((1, Ep), lambda i: (0, 0)),    # w1 (VMEM-resident)
                pl.BlockSpec((1, Ep), lambda i: (0, 0)),    # b1
                pl.BlockSpec((Ep, Ep), lambda i: (0, 0)),   # w2
                pl.BlockSpec((1, Ep), lambda i: (0, 0)),    # b2
            ],
            out_specs=pl.BlockSpec((TB, Ep), lambda i: (i, 0)),
        ),
        compiler_params=pltpu.CompilerParams(
            dimension_semantics=("parallel",),              # shard batch on v7x's 2 TCs
        ),
    )(t_p, w1_p, b1_p, w2_p, b2_p)

    return out[:B, :E]


def init_params(key, embed_dim=6):
    """Deterministic init mimicking nn.Linear's default uniform(-1/sqrt(fan_in), ...)."""
    k1, k2, k3, k4 = jax.random.split(key, 4)
    bound1 = 1.0 / jnp.sqrt(1.0)          # fan_in of linear1 = 1
    bound2 = 1.0 / jnp.sqrt(embed_dim)    # fan_in of linear2 = embed_dim
    w1 = jax.random.uniform(k1, (1, embed_dim), jnp.float32, -bound1, bound1)
    b1 = jax.random.uniform(k2, (1, embed_dim), jnp.float32, -bound1, bound1)
    w2 = jax.random.uniform(k3, (embed_dim, embed_dim), jnp.float32, -bound2, bound2)
    b2 = jax.random.uniform(k4, (1, embed_dim), jnp.float32, -bound2, bound2)
    return w1, b1, w2, b2


if __name__ == "__main__":
    key = jax.random.PRNGKey(0)
    k_t, k_p = jax.random.split(key)

    embed_dim = 6
    batch = 8
    # Example timesteps, e.g. integer steps of a diffusion process.
    t = jax.random.randint(k_t, (batch,), 0, 1000).astype(jnp.float32)

    w1, b1, w2, b2 = init_params(k_p, embed_dim)

    out = time_embedding(t, w1, b1, w2, b2)
    out = jax.block_until_ready(out)

    # Pure-JAX reference check.
    t2d = t.reshape(-1, 1)
    ref = jnp.maximum(t2d @ w1 + b1, 0.0) @ w2 + b2
    assert out.shape == (batch, embed_dim)
    assert jnp.allclose(out, ref, atol=1e-4, rtol=1e-4)

    print("KERNEL_OK")
</pallas_src>

<mosaic_0001>
module attributes {stable_mosaic.version = 11 : i64} {
  func.func @time_embedding_kernel(%arg0: i32, %arg1: memref<8x1xf32, #tpu.memory_space<vmem>>, %arg2: memref<1x128xf32, #tpu.memory_space<vmem>>, %arg3: memref<1x128xf32, #tpu.memory_space<vmem>>, %arg4: memref<128x128xf32, #tpu.memory_space<vmem>>, %arg5: memref<1x128xf32, #tpu.memory_space<vmem>>, %arg6: memref<8x128xf32, #tpu.memory_space<vmem>>) attributes {dimension_semantics = [#tpu.dimension_semantics<parallel>], iteration_bounds = array<i64: 1>, scalar_prefetch = 0 : i64, scratch_operands = 0 : i64, tpu.core_type = #tpu.core_type<tc>, window_params = [{transform_indices = @transform_0, window_bounds = array<i64: 8, 1>}, {pipeline_mode = #tpu.pipeline_mode<synchronous>, transform_indices = @transform_1, window_bounds = array<i64: 1, 128>}, {pipeline_mode = #tpu.pipeline_mode<synchronous>, transform_indices = @transform_2, window_bounds = array<i64: 1, 128>}, {pipeline_mode = #tpu.pipeline_mode<synchronous>, transform_indices = @transform_3, window_bounds = array<i64: 128, 128>}, {pipeline_mode = #tpu.pipeline_mode<synchronous>, transform_indices = @transform_4, window_bounds = array<i64: 1, 128>}, {transform_indices = @transform_5, window_bounds = array<i64: 8, 128>}]} {
    %c0 = arith.constant 0 : index
    %c0_0 = arith.constant 0 : index
    %0 = vector.load %arg1[%c0, %c0_0] : memref<8x1xf32, #tpu.memory_space<vmem>>, vector<8x1xf32>
    %c0_1 = arith.constant 0 : index
    %c0_2 = arith.constant 0 : index
    %1 = vector.load %arg2[%c0_1, %c0_2] : memref<1x128xf32, #tpu.memory_space<vmem>>, vector<1x128xf32>
    %2 = vector.broadcast %0 : vector<8x1xf32> to vector<8x128xf32>
    %3 = vector.broadcast %1 : vector<1x128xf32> to vector<8x128xf32>
    %4 = arith.mulf %2, %3 : vector<8x128xf32>
    %c0_3 = arith.constant 0 : index
    %c0_4 = arith.constant 0 : index
    %5 = vector.load %arg3[%c0_3, %c0_4] : memref<1x128xf32, #tpu.memory_space<vmem>>, vector<1x128xf32>
    %6 = vector.broadcast %5 : vector<1x128xf32> to vector<8x128xf32>
    %7 = arith.addf %4, %6 : vector<8x128xf32>
    %cst = arith.constant 0.000000e+00 : f32
    %8 = vector.broadcast %cst : f32 to vector<8x128xf32>
    %9 = arith.maximumf %7, %8 : vector<8x128xf32>
    %c0_5 = arith.constant 0 : index
    %c0_6 = arith.constant 0 : index
    %10 = vector.load %arg4[%c0_5, %c0_6] : memref<128x128xf32, #tpu.memory_space<vmem>>, vector<128x128xf32>
    %cst_7 = arith.constant dense<0.000000e+00> : vector<8x128xf32>
    %11 = tpu.matmul %9, %10, %cst_7 {dimension_numbers = #tpu.dot_dimension_numbers<[1], [0], [0], [1], [0, 0, 1, 1], [], []>} : vector<8x128xf32>, vector<128x128xf32>, vector<8x128xf32> -> vector<8x128xf32>
    %c0_8 = arith.constant 0 : index
    %c0_9 = arith.constant 0 : index
    %12 = vector.load %arg5[%c0_8, %c0_9] : memref<1x128xf32, #tpu.memory_space<vmem>>, vector<1x128xf32>
    %13 = vector.broadcast %12 : vector<1x128xf32> to vector<8x128xf32>
    %14 = arith.addf %11, %13 : vector<8x128xf32>
    %c0_10 = arith.constant 0 : index
    %c0_11 = arith.constant 0 : index
    %15 = vector.load %arg6[%c0_10, %c0_11] : memref<8x128xf32, #tpu.memory_space<vmem>>, vector<8x128xf32>
    tpu.vector_store %arg6[%c0_10, %c0_11], %14 {strides = array<i32>} : memref<8x128xf32, #tpu.memory_space<vmem>>, vector<8x128xf32>,
    return
  }
  func.func @transform_0(%arg0: i32) -> (i32, i32) {
    %c0_i32 = arith.constant 0 : i32
    %c0_i32_0 = arith.constant 0 : i32
    return %arg0, %c0_i32 : i32, i32
  }
  func.func @transform_1(%arg0: i32) -> (i32, i32) {
    %c0_i32 = arith.constant 0 : i32
    %c0_i32_0 = arith.constant 0 : i32
    %c0_i32_1 = arith.constant 0 : i32
    return %c0_i32, %c0_i32_0 : i32, i32
  }
  func.func @transform_2(%arg0: i32) -> (i32, i32) {
    %c0_i32 = arith.constant 0 : i32
    %c0_i32_0 = arith.constant 0 : i32
    %c0_i32_1 = arith.constant 0 : i32
    return %c0_i32, %c0_i32_0 : i32, i32
  }
  func.func @transform_3(%arg0: i32) -> (i32, i32) {
    %c0_i32 = arith.constant 0 : i32
    %c0_i32_0 = arith.constant 0 : i32
    %c0_i32_1 = arith.constant 0 : i32
    return %c0_i32, %c0_i32_0 : i32, i32
  }
  func.func @transform_4(%arg0: i32) -> (i32, i32) {
    %c0_i32 = arith.constant 0 : i32
    %c0_i32_0 = arith.constant 0 : i32
    %c0_i32_1 = arith.constant 0 : i32
    return %c0_i32, %c0_i32_0 : i32, i32
  }
  func.func @transform_5(%arg0: i32) -> (i32, i32) {
    %c0_i32 = arith.constant 0 : i32
    %c0_i32_0 = arith.constant 0 : i32
    return %arg0, %c0_i32 : i32, i32
  }
}

</mosaic_0001>

<bundles_post_ra>
// kernel: tpu_custom_call.1
= control target key start
LH: loop header
LB: loop body
LE: loop exit
PB: predicated region body
PF: predicated region fallthrough
CT: control target
= control target key end

     0   :  { %10 = vsyncpa [#allocation3], 0  ;;  %s377_s0 = inlined_call_operand.vmem [shape: f32[8,1], index: 0, kind: input, shape index: {}]   ;;  %s378_s1 = inlined_call_operand.vmem [shape: f32[1,128], index: 1, kind: input, shape index: {}]   ;;  %s379_s2 = inlined_call_operand.vmem [shape: f32[1,128], index: 2, kind: input, shape index: {}]   ;;  %s380_s3 = inlined_call_operand.hbm [shape: f32[128,128], index: 3, kind: input, shape index: {}]   ;;  %s381_s4 = inlined_call_operand.vmem [shape: f32[1,128], index: 4, kind: input, shape index: {}]   ;;  %s382_s5 = inlined_call_operand.hbm [shape: f32[8,128], index: 5, kind: output, shape index: {}]  }
   0x1   :  { %11 = vsyncpa [#allocation4], 0  ;;  %s303_s18 = smov [#allocation2]   ;;  %s255_s22 = scalar_lea.hbm %s380_s3, 2048 }
   0x2   :  { %s23_s19 = sshll.u32 %s303_s18, 4  ;;  %p256_p0 = scmp.ne.s32.totalorder %s380_s3, %s255_s22  ;;  %s24_s19 = int_to_ptr.vmem [resolvable:$true] %s23_s19 }
   0x3   :  { %p259_p1 = scmp.lt.u32.totalorder %s255_s22, %s380_s3 }
   0x5   :  { %p261_p2 = pnand %p259_p1, %p256_p0 }
   0x7   :  { %264 = shalt.err (!%p261_p2)
}
   0x8   :  { %s265_s27 = scalar_lea.vmem %s24_s19, 2048  ;;  %p270_p4 = scmp.lt.s32.totalorder %s24_s19, %s24_s19 }
   0x9   :  { %p266_p3 = scmp.ne.s32.totalorder %s24_s19, %s265_s27  ;;  %p271_p5 = scmp.lt.s32.totalorder %s265_s27, %s265_s27 }
   0xb   :  { %p272_p6 = por %p271_p5, %p270_p4 }
   0xd   :  { %p273_p7 = pnand %p272_p6, %p266_p3 }
   0xf   :  { %276 = shalt.err (!%p273_p7)
}
  0x10   :  { %s304_s28 = smov 128   ;;  %s305_s29 = smov 8  }
  0x11   :  { %29 = dma.hbm_to_vmem [thread:$0]  %s380_s3, 2048, %s24_s19, [#allocation3], %s304_s28, %s304_s28, %s305_s29  }
  0x12   :  { %299 = dma.done.wait [#allocation3], 2048  }
  0x13   :  { %300 = vsyncadd [#allocation3], 4294965248  ;;  %v306_v0 = vmov 0   ;;  %v307_v1 = vmov 0.0|0.0   ;;  %v35_v2 = vld [vmem:[%s377_s0] sm:$0xff]  ;;  %v59_v4 = vld [vmem:[#allocation2 + $0x8] sm:$0xff] }
  0x14   :  { %254 = vset.pattern.permute.xlu0 %v306_v0  ;;  %222 = vmatprep.subr.bf16.mxu0 %v307_v1  ;;  %v58_v3 = vld [vmem:[#allocation2] sm:$0xff]  ;;  %v60_v6 = vld [vmem:[#allocation2 + $0x10] sm:$0xff]  ;;  %v61_v7 = vld [vmem:[#allocation2 + $0x18] sm:$0xff]  ;;  %vm308_vm0 = vmmov 0   ;;  %v309_v12 = vmov 0.0   ;;  %s310_s13 = smov [#allocation5]  }
  0x15   :  { %39 = vperm.xlu0 %254, %v35_v2   ;;  %v223_v5 = vpack.c.bf16 %v59_v4, %v58_v3  ;;  %v226_v8 = vpack.c.bf16 %v61_v7, %v60_v6  ;;  %v62_v9 = vld [vmem:[#allocation2 + $0x20] sm:$0xff]  ;;  %v63_v10 = vld [vmem:[#allocation2 + $0x28] sm:$0xff]  ;;  %219 = vmatprep.mubr.msk.f32.mxu0 %vm308_vm0, %v309_v12  ;;  %v64_v13 = vld [vmem:[#allocation2 + $0x30] sm:$0xff]  ;;  %s158_s14 = sshll.u32 %s310_s13, 4  ;;  %s159_s14 = int_to_ptr.vmem [resolvable:$true] %s158_s14 }
  0x16   :  { %v229_v11 = vpack.c.bf16 %v63_v10, %v62_v9  ;;  %v65_v14 = vld [vmem:[#allocation2 + $0x38] sm:$0xff]  ;;  %v66_v16 = vld [vmem:[#allocation2 + $0x40] sm:$0xff]  ;;  %v67_v17 = vld [vmem:[#allocation2 + $0x48] sm:$0xff]  ;;  %p282_p9 = scmp.lt.s32.totalorder %s159_s14, %s159_s14 }
  0x17   :  { %224 = vmatpush3.bf16.msra.mxu0 %v223_v5  ;;  %v232_v15 = vpack.c.bf16 %v65_v14, %v64_v13  ;;  %v235_v18 = vpack.c.bf16 %v67_v17, %v66_v16  ;;  %v68_v19 = vld [vmem:[#allocation2 + $0x50] sm:$0xff]  ;;  %v69_v20 = vld [vmem:[#allocation2 + $0x58] sm:$0xff]  ;;  %v70_v22 = vld [vmem:[#allocation2 + $0x60] sm:$0xff] }
  0x18   :  { %225 = vmatprep.subr.bf16.mxu0 %v307_v1  ;;  %v238_v21 = vpack.c.bf16 %v69_v20, %v68_v19  ;;  %v71_v23 = vld [vmem:[#allocation2 + $0x68] sm:$0xff]  ;;  %v72_v25 = vld [vmem:[#allocation2 + $0x70] sm:$0xff]  ;;  %v73_v26 = vld [vmem:[#allocation2 + $0x78] sm:$0xff] }
  0x19   :  { %v241_v24 = vpack.c.bf16 %v71_v23, %v70_v22  ;;  %v244_v27 = vpack.c.bf16 %v73_v26, %v72_v25  ;;  %v167_v28 = vld [vmem:[%s378_s1] ss:$0 sm:$0xff]  ;;  %s277_s1 = scalar_lea.vmem %s159_s14, 128 }
  0x1a   :  { %v168_v29 = vld [vmem:[%s379_s2] ss:$0 sm:$0xff]  ;;  %p278_p8 = scmp.ne.s32.totalorder %s159_s14, %s277_s1  ;;  %p283_p10 = scmp.lt.s32.totalorder %s277_s1, %s277_s1 }
  0x1b   :  { %227 = vmatpush3.bf16.msra.mxu0 %v226_v8  ;;  %v169_v34 = vld [vmem:[%s381_s4] ss:$0 sm:$0xff] }
  0x1c   :  { %228 = vmatprep.subr.bf16.mxu0 %v307_v1  ;;  %p284_p11 = por %p283_p10, %p282_p9 }
  0x1e   :  { %p285_p12 = pnand %p284_p11, %p278_p8 }
  0x1f   :  { %230 = vmatpush3.bf16.msra.mxu0 %v229_v11 }
  0x20   :  { %231 = vmatprep.subr.bf16.mxu0 %v307_v1 }
  0x23   :  { %233 = vmatpush3.bf16.msra.mxu0 %v232_v15 }
  0x24   :  { %234 = vmatprep.subr.bf16.mxu0 %v307_v1 }
  0x27   :  { %236 = vmatpush3.bf16.msra.mxu0 %v235_v18 }
  0x28   :  { %237 = vmatprep.subr.bf16.mxu0 %v307_v1 }
  0x2b   :  { %239 = vmatpush3.bf16.msra.mxu0 %v238_v21 }
  0x2c   :  { %240 = vmatprep.subr.bf16.mxu0 %v307_v1 }
  0x2f   :  { %242 = vmatpush3.bf16.msra.mxu0 %v241_v24 }
  0x30   :  { %243 = vmatprep.subr.bf16.mxu0 %v307_v1 }
  0x33   :  { %245 = vmatpush3.bf16.msra.mxu0 %v244_v27 }
  0x94   :  { %v40_v30 = vpop.permute.xlu0 %39 }
  0x95   :  { %v48_v31 = vmul.f32 %v167_v28, %v40_v30 }
  0x97   :  { %v56_v32 = vadd.f32 %v168_v29, %v48_v31 }
  0x99   :  { %v57_v33 = vmax.f32 %v56_v32, 0.0 }
  0x9b   :  { %220 = vmatmul.mubr.f32.vlgmr.msra.gmra.mrb[0].mxu0 %v57_v33 }
 0x16e   :  { %v147_v35 = vpop.f32.mrb[0].mxu0 }
 0x16f   :  { %v148_v36 = vadd.f32 %v169_v34, %v147_v35  ;;  %v221_v37 = vpop.f32.mrb[1].mxu0 }
 0x171   :  { %151 = vst [vmem:[#allocation5] sm:$0xff] %v148_v36 }
 0x172   :  { %288 = shalt.err (!%p285_p12)
}
 0x173   :  { %s289_s16 = scalar_lea.hbm %s382_s5, 128 }
 0x174   :  { %p290_p13 = scmp.ne.s32.totalorder %s382_s5, %s289_s16  ;;  %p293_p0 = scmp.lt.u32.totalorder %s289_s16, %s382_s5 }
 0x176   :  { %p295_p1 = pnand %p293_p0, %p290_p13 }
 0x178   :  { %298 = shalt.err (!%p295_p1)
}
 0x179   :  { %161 = dma.vmem_to_hbm [thread:$0]  %s159_s14, 128, %s382_s5, [#allocation4]  }
 0x17a   :  { %301 = dma.done.wait [#allocation4], 128  }
 0x17b   :  { %302 = vsyncadd [#allocation4], 4294967168 }
 0x17c   :  { %165 = vsyncpa [#allocation3], 1 }
 0x17d   :  { %166 = vsyncpa [#allocation4], 1 }

</bundles_post_ra>
